<compile_context>
chip_gen: v6e
topology: v6e:2x2x1
jax: 0.10.0
libtpu: 0.0.40
codegen_flags: <defaults>
</compile_context>

<pallas_src>
import functools

import numpy as np
import jax
import jax.numpy as jnp
from jax.experimental import pallas as pl
from jax.experimental.pallas import tpu as pltpu

HIST = 18            # forward() hard-codes 18-wide history slices
FEAT = 3 * HIST      # 54 input features actually consumed by forward()
OUT_PAD = 128        # lane-dense output width (padded with zero columns)


# --------------------------------------------------------------------------
# Kernel: one fused affine map per batch tile.
# --------------------------------------------------------------------------
def _fused_affine_kernel(x_ref, w_ref, b_ref, o_ref):
    o_ref[...] = (jnp.dot(x_ref[...], w_ref[...],
                          preferred_element_type=jnp.float32)
                  + b_ref[...]).astype(o_ref.dtype)


# --------------------------------------------------------------------------
# One-time parameter preprocessing (hoisted out of the per-call path).
# --------------------------------------------------------------------------
def prepare_fused_params(params):
    """Fold fc1 -> i2h -> i2o into one (54, OUT_PAD) weight + (1, OUT_PAD) bias."""
    W1, b1 = params["W1"], params["b1"]          # (H, 18+H), (H,)
    W2, b2 = params["W2"], params["b2"]          # (H, 18+H), (H,)
    W3, b3 = params["W3"], params["b3"]          # (O, 18+H), (O,)

    W1a = W1[:, :HIST].T                         # (18, H)  history half of fc1
    W2a = W2[:, :HIST].T                         # (18, H)
    W2b = W2[:, HIST:].T                         # (H,  H)
    W3a = W3[:, :HIST].T                         # (18, O)
    W3b = W3[:, HIST:].T                         # (H,  O)

    blk_h0 = W3a                                 # coefficients of h0
    blk_h1 = W2a @ W3b                           # coefficients of h1
    blk_h2 = W1a @ (W2b @ W3b)                   # coefficients of h2
    W_comb = jnp.concatenate([blk_h0, blk_h1, blk_h2], axis=0)     # (54, O)
    b_comb = b1 @ W2b @ W3b + b2 @ W3b + b3                        # (O,)

    out_dim = int(b3.shape[0])
    Wp = jnp.zeros((FEAT, OUT_PAD), jnp.float32).at[:, :out_dim].set(
        W_comb.astype(jnp.float32))
    bp = jnp.zeros((1, OUT_PAD), jnp.float32).at[:, :out_dim].set(
        b_comb.astype(jnp.float32))
    return Wp, bp, out_dim


# --------------------------------------------------------------------------
# Jitted per-call path: pad batch, run the tiled pallas_call, slice back.
# --------------------------------------------------------------------------
@functools.partial(jax.jit, static_argnames=("out_dim",))
def _forward_impl(X, Wp, bp, out_dim):
    B = X.shape[0]
    x = X[:, :FEAT].astype(jnp.float32)

    # Batch tile: large enough to pipeline well, sublane (8) aligned, and well
    # under 64 MiB VMEM (v7x) even with double buffering:
    #   1024 * (54 + 128) * 4 B per buffer ~= 0.75 MiB.
    if B >= 1024:
        b_tile = 1024
    else:
        b_tile = max(8, -(-B // 8) * 8)          # round B up to a multiple of 8
    b_pad = -(-B // b_tile) * b_tile
    if b_pad != B:
        x = jnp.pad(x, ((0, b_pad - B), (0, 0)))

    grid = (pl.cdiv(b_pad, b_tile),)
    out = pl.pallas_call(
        _fused_affine_kernel,
        out_shape=jax.ShapeDtypeStruct((b_pad, OUT_PAD), jnp.float32),
        grid_spec=pltpu.PrefetchScalarGridSpec(
            num_scalar_prefetch=0,
            grid=grid,
            in_specs=[
                pl.BlockSpec((b_tile, FEAT), lambda i: (i, 0)),
                pl.BlockSpec((FEAT, OUT_PAD), lambda i: (0, 0)),
                pl.BlockSpec((1, OUT_PAD), lambda i: (0, 0)),
            ],
            out_specs=pl.BlockSpec((b_tile, OUT_PAD), lambda i: (i, 0)),
        ),
        compiler_params=pltpu.CompilerParams(
            dimension_semantics=("parallel",)),
        cost_estimate=pl.CostEstimate(
            flops=2 * b_pad * FEAT * OUT_PAD,
            transcendentals=0,
            bytes_accessed=(b_pad * FEAT * 4            # X read
                            + b_pad * OUT_PAD * 4       # out write
                            + (FEAT + 1) * OUT_PAD * 4  # weights + bias
                            ),
        ),
    )(x, Wp, bp)
    return out[:B, :out_dim]


def rnn_network_forward(X, fused_params):
    """X: (B, >=54). fused_params = prepare_fused_params(params)."""
    Wp, bp, out_dim = fused_params
    return _forward_impl(X, Wp, bp, out_dim)


# --------------------------------------------------------------------------
# Init + pure-JAX reference mirroring the PyTorch forward (layer-by-layer).
# --------------------------------------------------------------------------
def init_params(key, input_dim=18, hidden_dim=64, out_dim=8):
    """Mimics nn.Linear's default U(-1/sqrt(fan_in), 1/sqrt(fan_in)) init."""
    in_feats = input_dim + hidden_dim
    ks = jax.random.split(key, 6)
    bnd = 1.0 / np.sqrt(in_feats)
    return {
        "W1": jax.random.uniform(ks[0], (hidden_dim, in_feats), jnp.float32, -bnd, bnd),
        "b1": jax.random.uniform(ks[1], (hidden_dim,), jnp.float32, -bnd, bnd),
        "W2": jax.random.uniform(ks[2], (hidden_dim, in_feats), jnp.float32, -bnd, bnd),
        "b2": jax.random.uniform(ks[3], (hidden_dim,), jnp.float32, -bnd, bnd),
        "W3": jax.random.uniform(ks[4], (out_dim, in_feats), jnp.float32, -bnd, bnd),
        "b3": jax.random.uniform(ks[5], (out_dim,), jnp.float32, -bnd, bnd),
    }


def reference_forward(X, params, hidden_dim):
    B = X.shape[0]
    h0 = X[:, 0:HIST]
    h1 = X[:, HIST:2 * HIST]
    h2 = X[:, 2 * HIST:3 * HIST]
    zeros = jnp.zeros((B, hidden_dim), jnp.float32)
    x1 = jnp.concatenate([h2, zeros], axis=1)
    y1 = x1 @ params["W1"].T + params["b1"]
    x2 = jnp.concatenate([h1, y1], axis=1)
    y2 = x2 @ params["W2"].T + params["b2"]
    x3 = jnp.concatenate([h0, y2], axis=1)
    return x3 @ params["W3"].T + params["b3"]


if __name__ == "__main__":
    B, input_dim, hidden_dim, out_dim = 4, 18, 64, 8   # forward consumes 54 features

    key = jax.random.PRNGKey(0)
    k_x, k_p = jax.random.split(key)
    X = jax.random.normal(k_x, (B, FEAT), jnp.float32)          # (4, 54)
    params = init_params(k_p, input_dim, hidden_dim, out_dim)

    fused = prepare_fused_params(params)                        # one-time weight fold
    out = rnn_network_forward(X, fused)
    out = jax.block_until_ready(out)

    ref = reference_forward(X, params, hidden_dim)
    np.testing.assert_allclose(np.asarray(out), np.asarray(ref), rtol=1e-4, atol=1e-4)

    # TODO(synk): BatchNorm1d (`in_fn`) and `nonlin` are defined in __init__ but never
    # used in forward(); the single-matmul fold is exact only under that semantics.
    print("KERNEL_OK")
</pallas_src>

<mosaic_0001>
module attributes {stable_mosaic.version = 11 : i64} {
  func.func @_fused_affine_kernel(%arg0: i32, %arg1: memref<8x54xf32, #tpu.memory_space<vmem>>, %arg2: memref<54x128xf32, #tpu.memory_space<vmem>>, %arg3: memref<1x128xf32, #tpu.memory_space<vmem>>, %arg4: memref<8x128xf32, #tpu.memory_space<vmem>>) attributes {dimension_semantics = [#tpu.dimension_semantics<parallel>], iteration_bounds = array<i64: 1>, scalar_prefetch = 0 : i64, scratch_operands = 0 : i64, tpu.core_type = #tpu.core_type<tc>, window_params = [{transform_indices = @transform_0, window_bounds = array<i64: 8, 54>}, {pipeline_mode = #tpu.pipeline_mode<synchronous>, transform_indices = @transform_1, window_bounds = array<i64: 54, 128>}, {pipeline_mode = #tpu.pipeline_mode<synchronous>, transform_indices = @transform_2, window_bounds = array<i64: 1, 128>}, {transform_indices = @transform_3, window_bounds = array<i64: 8, 128>}]} {
    %c0 = arith.constant 0 : index
    %c0_0 = arith.constant 0 : index
    %0 = vector.load %arg1[%c0, %c0_0] : memref<8x54xf32, #tpu.memory_space<vmem>>, vector<8x54xf32>
    %c0_1 = arith.constant 0 : index
    %c0_2 = arith.constant 0 : index
    %1 = vector.load %arg2[%c0_1, %c0_2] : memref<54x128xf32, #tpu.memory_space<vmem>>, vector<54x128xf32>
    %cst = arith.constant dense<0.000000e+00> : vector<8x128xf32>
    %2 = tpu.matmul %0, %1, %cst {dimension_numbers = #tpu.dot_dimension_numbers<[1], [0], [0], [1], [0, 0, 1, 1], [], []>} : vector<8x54xf32>, vector<54x128xf32>, vector<8x128xf32> -> vector<8x128xf32>
    %c0_3 = arith.constant 0 : index
    %c0_4 = arith.constant 0 : index
    %3 = vector.load %arg3[%c0_3, %c0_4] : memref<1x128xf32, #tpu.memory_space<vmem>>, vector<1x128xf32>
    %4 = vector.broadcast %3 : vector<1x128xf32> to vector<8x128xf32>
    %5 = arith.addf %2, %4 : vector<8x128xf32>
    %c0_5 = arith.constant 0 : index
    %c0_6 = arith.constant 0 : index
    %6 = vector.load %arg4[%c0_5, %c0_6] : memref<8x128xf32, #tpu.memory_space<vmem>>, vector<8x128xf32>
    tpu.vector_store %arg4[%c0_5, %c0_6], %5 {strides = array<i32>} : memref<8x128xf32, #tpu.memory_space<vmem>>, vector<8x128xf32>,
    return
  }
  func.func @transform_0(%arg0: i32) -> (i32, i32) {
    %c0_i32 = arith.constant 0 : i32
    %c0_i32_0 = arith.constant 0 : i32
    return %arg0, %c0_i32 : i32, i32
  }
  func.func @transform_1(%arg0: i32) -> (i32, i32) {
    %c0_i32 = arith.constant 0 : i32
    %c0_i32_0 = arith.constant 0 : i32
    %c0_i32_1 = arith.constant 0 : i32
    return %c0_i32, %c0_i32_0 : i32, i32
  }
  func.func @transform_2(%arg0: i32) -> (i32, i32) {
    %c0_i32 = arith.constant 0 : i32
    %c0_i32_0 = arith.constant 0 : i32
    %c0_i32_1 = arith.constant 0 : i32
    return %c0_i32, %c0_i32_0 : i32, i32
  }
  func.func @transform_3(%arg0: i32) -> (i32, i32) {
    %c0_i32 = arith.constant 0 : i32
    %c0_i32_0 = arith.constant 0 : i32
    return %arg0, %c0_i32 : i32, i32
  }
}

</mosaic_0001>

<bundles_post_ra>
// kernel: _forward_impl.1
= control target key start
LH: loop header
LB: loop body
LE: loop exit
PB: predicated region body
PF: predicated region fallthrough
CT: control target
= control target key end

     0   :  { %8 = vsyncpa [#allocation3], 0  ;;  %s182_s12 = smov [#allocation2]   ;;  %s219_s0 = inlined_call_operand.vmem [shape: f32[8,54], index: 0, kind: input, shape index: {}]   ;;  %s220_s1 = inlined_call_operand.hbm [shape: f32[54,128], index: 1, kind: input, shape index: {}]   ;;  %s221_s2 = inlined_call_operand.vmem [shape: f32[1,128], index: 2, kind: input, shape index: {}]   ;;  %s222_s3 = inlined_call_operand.vmem [shape: f32[8,128], index: 3, kind: output, shape index: {}]  }
   0x1   :  { %s16_s13 = sshll.u32 %s182_s12, 4  ;;  %s17_s13 = int_to_ptr.vmem [resolvable:$true] %s16_s13 }
   0x2   :  { %s168_s14 = scalar_lea.vmem %s17_s13, 896  ;;  %p173_p1 = scmp.lt.s32.totalorder %s17_s13, %s17_s13 }
   0x3   :  { %p169_p0 = scmp.ne.s32.totalorder %s17_s13, %s168_s14  ;;  %p174_p2 = scmp.lt.s32.totalorder %s168_s14, %s168_s14 }
   0x5   :  { %p175_p3 = por %p174_p2, %p173_p1 }
   0x7   :  { %p176_p4 = pnand %p175_p3, %p169_p0 }
   0x9   :  { %179 = shalt.err (!%p176_p4)
}
   0xa   :  { %s183_s15 = smov 128   ;;  %s184_s16 = smov 8  }
   0xb   :  { %22 = dma.hbm_to_vmem [thread:$0]  %s220_s1, 896, %s17_s13, [#allocation3], %s183_s15, %s183_s15, %s184_s16  }
   0xc   :  { %180 = dma.done.wait [#allocation3], 896  }
   0xd   :  { %181 = vsyncadd [#allocation3], 4294966400  ;;  %v185_v0 = vmov 0.0   ;;  %vm186_vm0 = vmmov 0   ;;  %vm47_vm1 = vcmask 1045504   ;;  %v34_v2 = vld [vmem:[#allocation2 + $0x28] sm:$0xff] }
   0xe   :  { %138 = vmatprep.subr.mxu0 %v185_v0  ;;  %152 = vmatprep.mubr.msk.f32.mxu0 %vm186_vm0, %v185_v0  ;;  %v35_v1 = vld [vmem:[#allocation2 + $0x30] sm:$0x3f]  ;;  %v33_v3 = vld [vmem:[#allocation2 + $0x20] sm:$0xff]  ;;  %v32_v4 = vld [vmem:[#allocation2 + $0x18] sm:$0xff]  ;;  %vm43_vm2 = vcmask 441344  }
   0xf   :  { %139 = vmatpush3.msk.msra.mxu0 %vm47_vm1, %v35_v1  ;;  %v31_v5 = vld [vmem:[#allocation2 + $0x10] sm:$0xff]  ;;  %v30_v6 = vld [vmem:[#allocation2 + $0x8] sm:$0xff]  ;;  %v29_v7 = vld [vmem:[#allocation2] sm:$0xff] }
  0x10   :  { %140 = vmatprep.subr.mxu0 %v185_v0  ;;  %v28_v8 = vld [vmem:[%s219_s0] sm:$0xff] }
  0x11   :  { %141 = vmatpush3.msra.mxu0 %v34_v2  ;;  %v127_v9 = vld [vmem:[%s221_s2] ss:$0 sm:$0xff] }
  0x12   :  { %142 = vmatprep.subr.mxu0 %v185_v0 }
  0x13   :  { %143 = vmatpush3.msra.mxu0 %v33_v3 }
  0x14   :  { %144 = vmatprep.subr.mxu0 %v185_v0 }
  0x15   :  { %145 = vmatpush3.msra.mxu0 %v32_v4 }
  0x16   :  { %146 = vmatprep.subr.mxu0 %v185_v0 }
  0x17   :  { %147 = vmatpush3.msra.mxu0 %v31_v5 }
  0x18   :  { %148 = vmatprep.subr.mxu0 %v185_v0 }
  0x19   :  { %149 = vmatpush3.msra.mxu0 %v30_v6 }
  0x1a   :  { %150 = vmatprep.subr.mxu0 %v185_v0 }
  0x1b   :  { %151 = vmatpush3.msra.mxu0 %v29_v7 }
  0x1c   :  { %153 = vmatmul.mubr.msk.f32.vlgmr.msra.gmra.mxu0 %vm43_vm2, %v28_v8 }
  0xdc   :  { %v117_v10 = vpop.f32.mrf.mxu0 }
  0xdd   :  { %v118_v11 = vadd.f32 %v127_v9, %v117_v10 }
  0xde   :  { %v154_v12 = vpop.f32.mrf.mxu0 }
  0xdf   :  { %121 = vst [vmem:[%s222_s3] sm:$0xff] %v118_v11 }
  0xe0   :  { %126 = vsyncpa [#allocation3], 1 }

</bundles_post_ra>
